<compile_context>
chip_gen: v7x
topology: tpu7x:2x2x1
jax: 0.10.0
libtpu: 0.0.40
codegen_flags: <defaults>
</compile_context>

<pallas_src>
import functools

import jax
import jax.numpy as jnp
from jax.experimental import pallas as pl
from jax.experimental.pallas import tpu as pltpu

IN_FEATURES = 192          # matches nn.Linear(192, 1)
OUT_FEATURES = 1

_ACT_BUFFER_BUDGET = 8 << 20   # ~8 MiB per pipeline buffer for activations
_VMEM_LIMIT_BYTES = 32 << 20   # raise v5e's 16 MiB scoped default; safe on v6e/v7x


# ------------------------------ pallas kernel --------------------------------
def _disc_kernel(x_ref, w_ref, b_ref, o_ref, acc_ref, *, hw, t_hw, mask_tail):
    """Fused AdaptiveAvgPool2d((1,1)) + Flatten + Linear(192, 1).

    x_ref  : [tb, C, t_hw]  activations (C on sublanes, spatial on lanes)
    w_ref  : [1, C]         Linear weight, pre-scaled by 1/HW
    b_ref  : [1, 1]         Linear bias (SMEM scalar)
    o_ref  : [tb, 1, 1]     output (resident across the reduction axis)
    acc_ref: VMEM [tb, C]   running spatial sum (f32)
    """
    k = pl.program_id(1)

    @pl.when(k == 0)
    def _init():
        acc_ref[...] = jnp.zeros_like(acc_ref)

    x = x_ref[...].astype(jnp.float32)                        # [tb, C, t_hw]
    if mask_tail:
        col = jax.lax.broadcasted_iota(jnp.int32, x.shape, 2)
        x = jnp.where(k * t_hw + col < hw, x, 0.0)            # zero padded tail lanes
    acc_ref[...] += jnp.sum(x, axis=-1)                       # XLU lane reduce -> [tb, C]

    @pl.when(k == pl.num_programs(1) - 1)
    def _finalize():
        pooled = acc_ref[...]                                 # [tb, C]; 1/HW folded into w
        y = jnp.sum(pooled * w_ref[...], axis=-1, keepdims=True) + b_ref[0, 0]
        o_ref[...] = y.reshape(o_ref.shape).astype(o_ref.dtype)


# ------------------------------ tiling helper ---------------------------------
def _pick_tiles(b, c, hw, itemsize):
    """(batch tile, spatial tile): lane-aligned, VMEM-budgeted, megacore-friendly."""
    tb = min(b, 8)
    if b > 1 and -(-b // tb) < 2:          # keep >=2 batch tiles so v7x's 2 TCs share work
        tb = max(1, (b + 1) // 2)

    if hw <= 128:
        t_hw = hw                          # full spatial extent (valid per (8,128) rule)
    else:
        max_lanes = max(128, _ACT_BUFFER_BUDGET // (tb * c * itemsize))
        t_hw = min(hw, max_lanes, 4096)
        t_hw = max(128, (t_hw // 128) * 128)   # lane-aligned multiple of 128
    return tb, t_hw


# ------------------------------ host wrapper ----------------------------------
def discriminator_forward(params, x):
    """x: [B, 192, H, W]  ->  [B, 1]."""
    b, c, h, w = x.shape
    assert c == IN_FEATURES, f"expected {IN_FEATURES} channels, got {c}"
    hw = h * w

    # Free, copy-less reshape of contiguous NCHW (no transpose, no extra HBM pass).
    tokens = x.reshape(b, c, hw)

    tb, t_hw = _pick_tiles(b, c, hw, tokens.dtype.itemsize)
    n_b = -(-b // tb)
    n_hw = -(-hw // t_hw)
    mask_tail = (hw % t_hw) != 0

    # Fold 1/HW into the tiny weight; bias goes to SMEM as a (1,1) scalar.
    w_row = (params["w"].astype(jnp.float32) / float(hw)).reshape(1, IN_FEATURES)
    bias = params["b"].astype(jnp.float32).reshape(1, 1)

    cost = pl.CostEstimate(
        flops=2 * b * hw * c + 3 * b * c,
        transcendentals=0,
        bytes_accessed=tokens.size * tokens.dtype.itemsize
        + (w_row.size + bias.size + b * OUT_FEATURES) * 4,
    )

    kernel = functools.partial(_disc_kernel, hw=hw, t_hw=t_hw, mask_tail=mask_tail)

    out = pl.pallas_call(
        kernel,
        out_shape=jax.ShapeDtypeStruct((b, OUT_FEATURES, 1), x.dtype),
        grid_spec=pltpu.PrefetchScalarGridSpec(
            num_scalar_prefetch=0,
            grid=(n_b, n_hw),
            in_specs=[
                pl.BlockSpec((tb, c, t_hw), lambda bi, k: (bi, 0, k)),    # activations
                pl.BlockSpec((1, IN_FEATURES), lambda bi, k: (0, 0)),     # scaled weight
                pl.BlockSpec(memory_space=pltpu.MemorySpace.SMEM),        # bias scalar
            ],
            out_specs=pl.BlockSpec((tb, OUT_FEATURES, 1), lambda bi, k: (bi, 0, 0)),
            scratch_shapes=[pltpu.VMEM((tb, c), jnp.float32)],            # pooled-sum acc
        ),
        compiler_params=pltpu.CompilerParams(
            dimension_semantics=("parallel", "arbitrary"),
            vmem_limit_bytes=_VMEM_LIMIT_BYTES,
        ),
        cost_estimate=cost,
    )(tokens, w_row, bias)

    return out.reshape(b, OUT_FEATURES)


# ------------------------------ parameter init --------------------------------
def init_discriminator(key):
    """PyTorch nn.Linear default init: U(-1/sqrt(fan_in), 1/sqrt(fan_in))."""
    kw, kb = jax.random.split(key)
    bound = 1.0 / (IN_FEATURES ** 0.5)
    return {
        "w": jax.random.uniform(kw, (OUT_FEATURES, IN_FEATURES), jnp.float32,
                                -bound, bound),
        "b": jax.random.uniform(kb, (OUT_FEATURES,), jnp.float32, -bound, bound),
    }


# ----------------------------------- main -------------------------------------
if __name__ == "__main__":
    key = jax.random.PRNGKey(0)
    kp, kx = jax.random.split(key)

    params = init_discriminator(kp)
    x = jax.random.normal(kx, (2, IN_FEATURES, 16, 16), jnp.float32)

    fwd = jax.jit(lambda xx: discriminator_forward(params, xx))
    out = fwd(x)
    jax.block_until_ready(out)

    # Pure-JAX reference: AdaptiveAvgPool2d((1,1)) -> Flatten -> Linear(192, 1)
    ref = jnp.mean(x, axis=(2, 3)) @ params["w"].T + params["b"]

    assert out.shape == (2, OUT_FEATURES), out.shape
    assert out.dtype == jnp.float32
    assert jnp.allclose(out, ref, atol=1e-5, rtol=1e-5), (out, ref)
    print("KERNEL_OK")
</pallas_src>

<mosaic_0001>
module attributes {stable_mosaic.version = 11 : i64} {
  func.func @_disc_kernel(%arg0: i32, %arg1: i32, %arg2: memref<1x192x256xf32, #tpu.memory_space<vmem>>, %arg3: memref<1x192xf32, #tpu.memory_space<vmem>>, %arg4: memref<1x1xf32, #tpu.memory_space<smem>>, %arg5: memref<1x1x1xf32, #tpu.memory_space<vmem>>, %arg6: memref<1x192xf32, #tpu.memory_space<vmem>>) attributes {dimension_semantics = [#tpu.dimension_semantics<parallel>, #tpu.dimension_semantics<arbitrary>], iteration_bounds = array<i64: 2, 1>, scalar_prefetch = 0 : i64, scratch_operands = 1 : i64, tpu.core_type = #tpu.core_type<tc>, window_params = [{transform_indices = @transform_0, window_bounds = array<i64: 1, 192, 256>}, {pipeline_mode = #tpu.pipeline_mode<synchronous>, transform_indices = @transform_1, window_bounds = array<i64: 1, 192>}, {transform_indices = @transform_2, window_bounds = array<i64: 1, 1>}, {transform_indices = @transform_3, window_bounds = array<i64: 1, 1, 1>}]} {
    %c0_i32 = arith.constant 0 : i32
    %0 = arith.cmpi eq, %arg1, %c0_i32 : i32
    %1 = arith.extui %0 : i1 to i32
    %c0_i32_0 = arith.constant 0 : i32
    %2 = arith.cmpi ne, %1, %c0_i32_0 : i32
    scf.if %2 {
      %cst_9 = arith.constant 0.000000e+00 : f32
      %11 = vector.broadcast %cst_9 : f32 to vector<1x192xf32>
      %c0_10 = arith.constant 0 : index
      %c0_11 = arith.constant 0 : index
      %12 = vector.load %arg6[%c0_10, %c0_11] : memref<1x192xf32, #tpu.memory_space<vmem>>, vector<1x192xf32>
      tpu.vector_store %arg6[%c0_10, %c0_11], %11 {strides = array<i32>} : memref<1x192xf32, #tpu.memory_space<vmem>>, vector<1x192xf32>,
    } else {
    }
    %c0 = arith.constant 0 : index
    %c0_1 = arith.constant 0 : index
    %c0_2 = arith.constant 0 : index
    %3 = vector.load %arg2[%c0, %c0_1, %c0_2] : memref<1x192x256xf32, #tpu.memory_space<vmem>>, vector<1x192x256xf32>
    %c0_3 = arith.constant 0 : index
    %c0_4 = arith.constant 0 : index
    %4 = vector.load %arg6[%c0_3, %c0_4] : memref<1x192xf32, #tpu.memory_space<vmem>>, vector<1x192xf32>
    %cst = arith.constant dense<0.000000e+00> : vector<1x192xf32>
    %5 = vector.multi_reduction <add>, %3, %cst [2] : vector<1x192x256xf32> to vector<1x192xf32>
    %6 = arith.addf %4, %5 : vector<1x192xf32>
    %c0_5 = arith.constant 0 : index
    %c0_6 = arith.constant 0 : index
    %7 = vector.load %arg6[%c0_5, %c0_6] : memref<1x192xf32, #tpu.memory_space<vmem>>, vector<1x192xf32>
    tpu.vector_store %arg6[%c0_5, %c0_6], %6 {strides = array<i32>} : memref<1x192xf32, #tpu.memory_space<vmem>>, vector<1x192xf32>,
    %c0_i32_7 = arith.constant 0 : i32
    %8 = arith.cmpi eq, %arg1, %c0_i32_7 : i32
    %9 = arith.extui %8 : i1 to i32
    %c0_i32_8 = arith.constant 0 : i32
    %10 = arith.cmpi ne, %9, %c0_i32_8 : i32
    scf.if %10 {
      %c0_9 = arith.constant 0 : index
      %c0_10 = arith.constant 0 : index
      %11 = vector.load %arg6[%c0_9, %c0_10] : memref<1x192xf32, #tpu.memory_space<vmem>>, vector<1x192xf32>
      %c0_11 = arith.constant 0 : index
      %c0_12 = arith.constant 0 : index
      %12 = vector.load %arg3[%c0_11, %c0_12] : memref<1x192xf32, #tpu.memory_space<vmem>>, vector<1x192xf32>
      %13 = arith.mulf %11, %12 : vector<1x192xf32>
      %cst_13 = arith.constant dense<0.000000e+00> : vector<1xf32>
      %14 = vector.multi_reduction <add>, %13, %cst_13 [1] : vector<1x192xf32> to vector<1xf32>
      %15 = vector.shape_cast %14 : vector<1xf32> to vector<1x1xf32>
      %c0_14 = arith.constant 0 : index
      %c0_15 = arith.constant 0 : index
      %16 = memref.load %arg4[%c0_14, %c0_15] : memref<1x1xf32, #tpu.memory_space<smem>>
      %17 = vector.broadcast %16 : f32 to vector<1x1xf32>
      %18 = arith.addf %15, %17 : vector<1x1xf32>
      %19 = vector.shape_cast %18 : vector<1x1xf32> to vector<1x1x1xf32>
      %c0_16 = arith.constant 0 : index
      %c0_17 = arith.constant 0 : index
      %c0_18 = arith.constant 0 : index
      %20 = vector.load %arg5[%c0_16, %c0_17, %c0_18] : memref<1x1x1xf32, #tpu.memory_space<vmem>>, vector<1x1x1xf32>
      tpu.vector_store %arg5[%c0_16, %c0_17, %c0_18], %19 {strides = array<i32>} : memref<1x1x1xf32, #tpu.memory_space<vmem>>, vector<1x1x1xf32>,
    } else {
    }
    return
  }
  func.func @transform_0(%arg0: i32, %arg1: i32) -> (i32, i32, i32) {
    %c0_i32 = arith.constant 0 : i32
    %c0_i32_0 = arith.constant 0 : i32
    return %arg0, %c0_i32, %arg1 : i32, i32, i32
  }
  func.func @transform_1(%arg0: i32, %arg1: i32) -> (i32, i32) {
    %c0_i32 = arith.constant 0 : i32
    %c0_i32_0 = arith.constant 0 : i32
    %c0_i32_1 = arith.constant 0 : i32
    return %c0_i32, %c0_i32_0 : i32, i32
  }
  func.func @transform_2(%arg0: i32, %arg1: i32) -> (i32, i32) {
    %c0_i32 = arith.constant 0 : i32
    %c0_i32_0 = arith.constant 0 : i32
    %c0_i32_1 = arith.constant 0 : i32
    return %c0_i32, %c0_i32_0 : i32, i32
  }
  func.func @transform_3(%arg0: i32, %arg1: i32) -> (i32, i32, i32) {
    %c0_i32 = arith.constant 0 : i32
    %c0_i32_0 = arith.constant 0 : i32
    %c0_i32_1 = arith.constant 0 : i32
    return %arg0, %c0_i32, %c0_i32_0 : i32, i32, i32
  }
}

</mosaic_0001>

<bundles_post_ra>
// kernel: _lambda_.1
= control target key start
LH: loop header
LB: loop body
LE: loop exit
PB: predicated region body
PF: predicated region fallthrough
CT: control target
= control target key end

     0   :  { %s2716_s14 = smov 0   ;;  %s2718_s15 = smov 0   ;;  %s3307_s0 = inlined_call_operand.vmem [shape: f32[2,192,256], index: 0, kind: input, shape index: {}]   ;;  %s3308_s1 = inlined_call_operand.vmem [shape: f32[1,192], index: 1, kind: input, shape index: {}]   ;;  %s3309_s2 = inlined_call_operand.<no memory space> [shape: f32[1,1], index: 2, kind: input, shape index: {}]   ;;  %s3310_s3 = inlined_call_operand.vmem [shape: f32[2,1,1], index: 3, kind: output, shape index: {}]  }
   0x1   :  { %8 = sst [smem:[#allocation3]] %s3309_s2  ;;  %s2720_s16 = smov 0  }
   0x2 LB: > { %s26_s2 = sadd.s32 1, %s2684_s15  ;;  %p2632_p0 = scmp.ge.s32.totalorder %s2688_s16, 1  ;;  %s2688_s16 = sphi %s2720_s16, %s14_s16   ;;  %s2684_s15 = sphi %s2718_s15, %s3314_s15   ;;  %s2680_s14 = sphi %s2716_s14, %s3313_s14  }
   0x3   : > { %p28_p1 = scmp.ge.s32.totalorder %s26_s2, 2  ;;  %p157_p2 = scmp.lt.s32.totalorder %s2688_s16, 3 }
   0x5   : > { %s3316_s2 = smov (%p28_p1, %s26_s2), 0  ;;  %p158_p3 = pnand %p2632_p0, %p157_p2 }
   0x6   : > { %p184_p4 = scmp.lt.s32.totalorder (!%p158_p3), %s2680_s14, 1  ;;  %v2690_v46 = vmov (!%p158_p3), 0   ;;  %vm2377_vm1 = vcmask (!%p158_p3), 130112   ;;  %vm2384_vm2 = vcmask (!%p158_p3), 195712   ;;  %vm2391_vm3 = vcmask (!%p158_p3), 261312   ;;  %s2562_s23 = sld [smem:[#allocation3]] (!%p158_p3) }
   0x7   : > { %161 = sbr.rel (%p158_p3) target bundleno = 595 (0x253), region = 32  ;;  %2664 = vset.pattern.permute.xlu0 (!%p158_p3), %v2690_v46  ;;  %2665 = vset.pattern.permute.xlu1 (!%p158_p3), %v2690_v46  ;;  %vm2398_vm4 = vcmask (!%p158_p3), 326912   ;;  %vm2405_vm5 = vcmask (!%p158_p3), 392512   ;;  %vm2412_vm6 = vcmask (!%p158_p3), 458112   ;;  %vm2419_vm7 = vcmask (!%p158_p3), 523712  }
   0x8   : > { %vm2426_vm8 = vcmask (!%p158_p3), 589312   ;;  %vm2433_vm9 = vcmask (!%p158_p3), 654912   ;;  %vm2440_vm10 = vcmask (!%p158_p3), 720512   ;;  %vm2447_vm11 = vcmask (!%p158_p3), 786112  }
   0x9   : > { %vm2454_vm12 = vcmask (!%p158_p3), 851712   ;;  %vm2461_vm13 = vcmask (!%p158_p3), 917312   ;;  %vm2468_vm14 = vcmask (!%p158_p3), 982912   ;;  %vm2475_vm15 = vcmask (!%p158_p3), 1048512  }
   0xe   : > { %s3318_s14 = smov (!%p184_p4, %s2680_s14), 1 }
   0xf   : > { %s2636_s17 = smul.u32 384, %s3318_s14  ;;  %s195_s26 = scalar_lea.vmem %s3310_s3, %s3318_s14 }
  0x11   : > { %s2740_s20 = scalar_lea.vmem %s3307_s0, %s2636_s17 }
  0x12   : > { %v209_v0 = vld [vmem:[%s2740_s20 + $0x20] sm:$0xff]  ;;  %v210_v1 = vld [vmem:[%s2740_s20 + $0x28] sm:$0xff]  ;;  %v211_v5 = vld [vmem:[%s2740_s20 + $0x30] sm:$0xff] }
  0x13   : > { %v205_v2 = vld [vmem:[%s2740_s20] sm:$0xff]  ;;  %v260_v3 = vadd.f32 %v210_v1, %v209_v0  ;;  %v206_v4 = vld [vmem:[%s2740_s20 + $0x8] sm:$0xff]  ;;  %v212_v6 = vld [vmem:[%s2740_s20 + $0x38] sm:$0xff] }
  0x14   : > { %v254_v7 = vadd.f32 %v206_v4, %v205_v2  ;;  %v207_v8 = vld [vmem:[%s2740_s20 + $0x10] sm:$0xff]  ;;  %v208_v9 = vld [vmem:[%s2740_s20 + $0x18] sm:$0xff]  ;;  %v263_v10 = vadd.f32 %v212_v6, %v211_v5  ;;  %v213_v14 = vld [vmem:[%s2740_s20 + $0x40] sm:$0xff] }
  0x15   : > { %261 = vadd.xlane.f32.xlu1 %v260_v3  ;;  %v257_v11 = vadd.f32 %v208_v9, %v207_v8  ;;  %v215_v12 = vld [vmem:[%s2740_s20 + $0x50] sm:$0xff]  ;;  %v216_v13 = vld [vmem:[%s2740_s20 + $0x58] sm:$0xff]  ;;  %v214_v15 = vld [vmem:[%s2740_s20 + $0x48] sm:$0xff]  ;;  %v200_v9 = vlaneseq }
  0x16   : > { %255 = vadd.xlane.f32.xlu0 %v254_v7  ;;  %v269_v16 = vadd.f32 %v216_v13, %v215_v12  ;;  %v219_v17 = vld [vmem:[%s2740_s20 + $0x70] sm:$0xff]  ;;  %v220_v18 = vld [vmem:[%s2740_s20 + $0x78] sm:$0xff]  ;;  %v266_v19 = vadd.f32 %v214_v15, %v213_v14  ;;  %v217_v20 = vld [vmem:[%s2740_s20 + $0x60] sm:$0xff] }
  0x17   : > { %v218_v21 = vld [vmem:[%s2740_s20 + $0x68] sm:$0xff]  ;;  %v275_v22 = vadd.f32 %v220_v18, %v219_v17  ;;  %v223_v23 = vld [vmem:[%s2740_s20 + $0x90] sm:$0xff]  ;;  %v224_v24 = vld [vmem:[%s2740_s20 + $0x98] sm:$0xff]  ;;  %v2791_v12 = vshrl.u32 %v200_v9, 7  ;;  %vm3187_vm0 = vcmp.lt.s32.totalorder %v200_v9, 192 }
  0x18   : > { %v272_v25 = vadd.f32 %v218_v21, %v217_v20  ;;  %v221_v26 = vld [vmem:[%s2740_s20 + $0x80] sm:$0xff]  ;;  %v222_v27 = vld [vmem:[%s2740_s20 + $0x88] sm:$0xff]  ;;  %v281_v28 = vadd.f32 %v224_v24, %v223_v23  ;;  %v239_v29 = vld [vmem:[%s2740_s20 + $0x110] sm:$0xff] }
  0x19   : > { %264 = vadd.xlane.f32.xlu1 %v263_v10  ;;  %v240_v30 = vld [vmem:[%s2740_s20 + $0x118] sm:$0xff]  ;;  %v278_v31 = vadd.f32 %v222_v27, %v221_v26  ;;  %v237_v32 = vld [vmem:[%s2740_s20 + $0x100] sm:$0xff]  ;;  %v238_v33 = vld [vmem:[%s2740_s20 + $0x108] sm:$0xff]  ;;  %v2691_v10 = vmov 1966171168   ;;  %v2794_v14 = vsub.s32 0, %v2791_v12 }
  0x1a   : > { %258 = vadd.xlane.f32.xlu0 %v257_v11  ;;  %v305_v34 = vadd.f32 %v240_v30, %v239_v29  ;;  %v241_v35 = vld [vmem:[%s2740_s20 + $0x120] sm:$0xff]  ;;  %v242_v36 = vld [vmem:[%s2740_s20 + $0x128] sm:$0xff]  ;;  %v302_v37 = vadd.f32 %v238_v33, %v237_v32  ;;  %v243_v41 = vld [vmem:[%s2740_s20 + $0x130] sm:$0xff]  ;;  %v1123_v11 = vunpack.c.l.s4 %v2691_v10  ;;  %v2797_v15 = vsub.s32 1, %v2791_v12 }
  0x1b   : > { %v225_v38 = vld [vmem:[%s2740_s20 + $0xa0] sm:$0xff]  ;;  %v226_v39 = vld [vmem:[%s2740_s20 + $0xa8] sm:$0xff]  ;;  %v308_v40 = vadd.f32 %v242_v36, %v241_v35  ;;  %v244_v42 = vld [vmem:[%s2740_s20 + $0x138] sm:$0xff]  ;;  %v2803_v17 = vsub.s32 3, %v2791_v12  ;;  %v2806_v18 = vsub.s32 4, %v2791_v12  ;;  %v2812_v20 = vsub.s32 6, %v2791_v12 }
  0x1c   : > { %v284_v43 = vadd.f32 %v226_v39, %v225_v38  ;;  %v227_v44 = vld [vmem:[%s2740_s20 + $0xb0] sm:$0xff]  ;;  %v228_v45 = vld [vmem:[%s2740_s20 + $0xb8] sm:$0xff]  ;;  %v311_v47 = vadd.f32 %v244_v42, %v243_v41  ;;  %v245_v48 = vld [vmem:[%s2740_s20 + $0x140] sm:$0xff]  ;;  %v1124_v13 = vunpack.c.0.s8 %v1123_v11  ;;  %v2815_v21 = vsub.s32 7, %v2791_v12 }
  0x1d   : > { %270 = vadd.xlane.f32.xlu1 %v269_v16  ;;  %v246_v49 = vld [vmem:[%s2740_s20 + $0x148] sm:$0xff]  ;;  %v287_v50 = vadd.f32 %v228_v45, %v227_v44  ;;  %v229_v51 = vld [vmem:[%s2740_s20 + $0xc0] sm:$0xff]  ;;  %v247_v54 = vld [vmem:[%s2740_s20 + $0x150] sm:$0xff]  ;;  %v2800_v16 = vsub.s32 2, %v2791_v12 }
  0x1e   : > { %267 = vadd.xlane.f32.xlu0 %v266_v19  ;;  %v230_v52 = vld [vmem:[%s2740_s20 + $0xc8] sm:$0xff]  ;;  %v314_v53 = vadd.f32 %v246_v49, %v245_v48  ;;  %v248_v55 = vld [vmem:[%s2740_s20 + $0x158] sm:$0xff]  ;;  %v231_v57 = vld [vmem:[%s2740_s20 + $0xd0] sm:$0xff]  ;;  %v2809_v19 = vsub.s32 5, %v2791_v12  ;;  %v2818_v23 = vsub.s32 %v1124_v13, %v2791_v12 }
  0x1f   : > { %v290_v56 = vadd.f32 %v230_v52, %v229_v51  ;;  %v232_v58 = vld [vmem:[%s2740_s20 + $0xd8] sm:$0xff]  ;;  %v317_v59 = vadd.f32 %v248_v55, %v247_v54  ;;  %v249_v60 = vld [vmem:[%s2740_s20 + $0x160] sm:$0xff]  ;;  %v250_v61 = vld [vmem:[%s2740_s20 + $0x168] sm:$0xff] }
  0x20   : > { %v293_v62 = vadd.f32 %v232_v58, %v231_v57  ;;  %v233_v63 = vld [vmem:[%s2740_s20 + $0xe0] sm:$0xff]  ;;  %v234_v0 = vld [vmem:[%s2740_s20 + $0xe8] sm:$0xff]  ;;  %v320_v1 = vadd.f32 %v250_v61, %v249_v60  ;;  %v251_v2 = vld [vmem:[%s2740_s20 + $0x170] sm:$0xff] }
  0x21   : > { %276 = vadd.xlane.f32.xlu1 %v275_v22  ;;  %v252_v3 = vld [vmem:[%s2740_s20 + $0x178] sm:$0xff]  ;;  %v296_v4 = vadd.f32 %v234_v0, %v233_v63  ;;  %v235_v5 = vld [vmem:[%s2740_s20 + $0xf0] sm:$0xff] }
  0x22   : > { %273 = vadd.xlane.f32.xlu0 %v272_v25  ;;  %v236_v6 = vld [vmem:[%s2740_s20 + $0xf8] sm:$0xff]  ;;  %v323_v7 = vadd.f32 %v252_v3, %v251_v2 }
  0x23   : > { %v299_v8 = vadd.f32 %v236_v6, %v235_v5 }
  0x25   : > { %282 = vadd.xlane.f32.xlu1 %v281_v28 }
  0x26   : > { %279 = vadd.xlane.f32.xlu0 %v278_v31 }
  0x29   : > { %306 = vadd.xlane.f32.xlu1 %v305_v34 }
  0x2a   : > { %303 = vadd.xlane.f32.xlu0 %v302_v37 }
  0x2d   : > { %309 = vadd.xlane.f32.xlu1 %v308_v40 }
  0x2e   : > { %285 = vadd.xlane.f32.xlu0 %v284_v43 }
  0x31   : > { %312 = vadd.xlane.f32.xlu1 %v311_v47 }
  0x32   : > { %288 = vadd.xlane.f32.xlu0 %v287_v50 }
  0x35   : > { %315 = vadd.xlane.f32.xlu1 %v314_v53 }
  0x36   : > { %291 = vadd.xlane.f32.xlu0 %v290_v56 }
  0x39   : > { %318 = vadd.xlane.f32.xlu1 %v317_v59 }
  0x3a   : > { %294 = vadd.xlane.f32.xlu0 %v293_v62 }
  0x3d   : > { %321 = vadd.xlane.f32.xlu1 %v320_v1 }
  0x3e   : > { %297 = vadd.xlane.f32.xlu0 %v296_v4 }
  0x41   : > { %324 = vadd.xlane.f32.xlu1 %v323_v7 }
  0x42   : > { %300 = vadd.xlane.f32.xlu0 %v299_v8 }
  0xa2   : > { %v262_v22 = vpop.xlane.xlu1 %261 }
  0xa3   : > { %v256_v24 = vpop.xlane.xlu0 %255  ;;  %v417_v25 = vrot.slane %v262_v22, %v2794_v14  ;;  %v421_v26 = vrot.slane %v262_v22, %v2797_v15  ;;  %v425_v27 = vrot.slane %v262_v22, %v2800_v16  ;;  %v429_v28 = vrot.slane %v262_v22, %v2803_v17 }
  0xa4   : > { %v353_v29 = vrot.slane %v256_v24, %v2794_v14  ;;  %v357_v30 = vrot.slane %v256_v24, %v2797_v15  ;;  %v361_v31 = vrot.slane %v256_v24, %v2800_v16  ;;  %v365_v32 = vrot.slane %v256_v24, %v2803_v17 }
  0xa5   : > { %v369_v33 = vrot.slane %v256_v24, %v2806_v18  ;;  %v373_v34 = vrot.slane %v256_v24, %v2809_v19  ;;  %v377_v35 = vrot.slane %v256_v24, %v2812_v20  ;;  %v381_v36 = vrot.slane %v256_v24, %v2815_v21 }
  0xa6   : > { %v2832_v37 = vpop.xlane.xlu1 %264  ;;  %v1118_v38 = vcombine.low %v353_v29, %v357_v30  ;;  %v1119_v39 = vcombine.low %v361_v31, %v365_v32  ;;  %v433_v40 = vrot.slane %v262_v22, %v2806_v18  ;;  %v437_v41 = vrot.slane %v262_v22, %v2809_v19 }
  0xa7   : > { %v259_v42 = vpop.xlane.xlu0 %258  ;;  %v1120_v43 = vcombine.low %v369_v33, %v373_v34  ;;  %v1121_v44 = vcombine.low %v377_v35, %v381_v36  ;;  %v441_v45 = vrot.slane %v262_v22, %v2812_v20  ;;  %v445_v46 = vrot.slane %v262_v22, %v2815_v21 }
  0xa8   : > { %v1128_v47 = vrot.slane %v1118_v38, %v2818_v23  ;;  %v1135_v48 = vrot.slane %v1119_v39, %v2818_v23  ;;  %v385_v49 = vrot.slane %v259_v42, %v2794_v14  ;;  %v389_v50 = vrot.slane %v259_v42, %v2797_v15 }
  0xa9   : > { %v1142_v51 = vrot.slane %v1120_v43, %v2818_v23  ;;  %v1149_v52 = vrot.slane %v1121_v44, %v2818_v23  ;;  %v393_v53 = vrot.slane %v259_v42, %v2800_v16  ;;  %v397_v54 = vrot.slane %v259_v42, %v2803_v17 }
  0xaa   : > { %v2846_v55 = vpop.xlane.xlu1 %270  ;;  %v1150_v56 = vcombine.low %v1128_v47, %v1135_v48  ;;  %v401_v57 = vrot.slane %v259_v42, %v2806_v18  ;;  %v405_v58 = vrot.slane %v259_v42, %v2809_v19  ;;  %v409_v59 = vrot.slane %v259_v42, %v2812_v20 }
  0xab   : > { %v1151_v60 = vcombine.low %v1142_v51, %v1149_v52  ;;  %v413_v61 = vrot.slane %v259_v42, %v2815_v21  ;;  %v1167_v62 = vcombine.low %v385_v49, %v389_v50  ;;  %v1168_v63 = vcombine.low %v393_v53, %v397_v54  ;;  %v268_v54 = vpop.xlane.xlu0 %267 }
  0xac   : > { %v1158_v0 = vrot.slane %v1150_v56, %v2818_v23  ;;  %v1169_v1 = vcombine.low %v401_v57, %v405_v58  ;;  %v1216_v2 = vcombine.low %v417_v25, %v421_v26  ;;  %v1217_v3 = vcombine.low %v425_v27, %v429_v28 }
  0xad   : > { %v1165_v4 = vrot.slane %v1151_v60, %v2818_v23  ;;  %v1170_v5 = vcombine.low %v409_v59, %v413_v61  ;;  %v1177_v6 = vrot.slane %v1167_v62, %v2818_v23  ;;  %v1184_v7 = vrot.slane %v1168_v63, %v2818_v23 }
  0xae   : > { %v2856_v8 = vpop.xlane.xlu1 %276  ;;  %v1191_v10 = vrot.slane %v1169_v1, %v2818_v23  ;;  %v1218_v11 = vcombine.low %v433_v40, %v437_v41  ;;  %v1219_v13 = vcombine.low %v441_v45, %v445_v46  ;;  %v1226_v22 = vrot.slane %v1216_v2, %v2818_v23 }
  0xaf   : > { %v1166_v24 = vcombine.low %v1158_v0, %v1165_v4  ;;  %v1198_v29 = vrot.slane %v1170_v5, %v2818_v23  ;;  %v1199_v25 = vcombine.low %v1177_v6, %v1184_v7  ;;  %v1233_v26 = vrot.slane %v1217_v3, %v2818_v23 }
  0xb0   : > { %v1240_v27 = vrot.slane %v1218_v11, %v2818_v23  ;;  %v1247_v28 = vrot.slane %v1219_v13, %v2818_v23  ;;  %v449_v30 = vrot.slane %v2832_v37, %v2794_v14  ;;  %v453_v31 = vrot.slane %v2832_v37, %v2797_v15 }
  0xb1   : > { %2295 = vperm.xlu0 %2664, %v1166_v24   ;;  %v1200_v32 = vcombine.low %v1191_v10, %v1198_v29  ;;  %v1207_v33 = vrot.slane %v1199_v25, %v2818_v23  ;;  %v1248_v34 = vcombine.low %v1226_v22, %v1233_v26  ;;  %v457_v35 = vrot.slane %v2832_v37, %v2800_v16 }
  0xb2   : > { %v283_v36 = vpop.xlane.xlu1 %282  ;;  %v1249_v38 = vcombine.low %v1240_v27, %v1247_v28  ;;  %v461_v39 = vrot.slane %v2832_v37, %v2803_v17  ;;  %v465_v40 = vrot.slane %v2832_v37, %v2806_v18  ;;  %v469_v41 = vrot.slane %v2832_v37, %v2809_v19 }
  0xb3   : > { %v1214_v42 = vrot.slane %v1200_v32, %v2818_v23  ;;  %v1256_v43 = vrot.slane %v1248_v34, %v2818_v23  ;;  %v473_v44 = vrot.slane %v2832_v37, %v2812_v20  ;;  %v477_v45 = vrot.slane %v2832_v37, %v2815_v21 }
  0xb4   : > { %v1263_v46 = vrot.slane %v1249_v38, %v2818_v23  ;;  %v1265_v47 = vcombine.low %v449_v30, %v453_v31  ;;  %v1266_v48 = vcombine.low %v457_v35, %v461_v39  ;;  %v1267_v49 = vcombine.low %v465_v40, %v469_v41 }
  0xb5   : > { %v1215_v50 = vcombine.low %v1207_v33, %v1214_v42  ;;  %v1268_v51 = vcombine.low %v473_v44, %v477_v45  ;;  %v641_v52 = vrot.slane %v283_v36, %v2794_v14  ;;  %v645_v53 = vrot.slane %v283_v36, %v2797_v15 }
  0xb6   : > { %v1264_v56 = vcombine.low %v1256_v43, %v1263_v46  ;;  %v1275_v57 = vrot.slane %v1265_v47, %v2818_v23  ;;  %v1282_v58 = vrot.slane %v1266_v48, %v2818_v23  ;;  %v1289_v59 = vrot.slane %v1267_v49, %v2818_v23  ;;  %v307_v26 = vpop.xlane.xlu1 %306 }
  0xb7   : > { %2298 = vperm.xlu1 %2665, %v1215_v50   ;;  %v1296_v37 = vrot.slane %v1268_v51, %v2818_v23  ;;  %v649_v60 = vrot.slane %v283_v36, %v2800_v16  ;;  %v653_v61 = vrot.slane %v283_v36, %v2803_v17  ;;  %v657_v62 = vrot.slane %v283_v36, %v2806_v18 }
  0xb8   : > { %v1297_v63 = vcombine.low %v1275_v57, %v1282_v58  ;;  %v661_v0 = vrot.slane %v283_v36, %v2809_v19  ;;  %v665_v1 = vrot.slane %v283_v36, %v2812_v20  ;;  %v669_v2 = vrot.slane %v283_v36, %v2815_v21 }
  0xb9   : > { %v1298_v3 = vcombine.low %v1289_v59, %v1296_v37  ;;  %v1559_v4 = vcombine.low %v641_v52, %v645_v53  ;;  %v1560_v5 = vcombine.low %v649_v60, %v653_v61  ;;  %v481_v6 = vrot.slane %v268_v54, %v2794_v14 }
  0xba   : > { %v1305_v7 = vrot.slane %v1297_v63, %v2818_v23  ;;  %v1561_v10 = vcombine.low %v657_v62, %v661_v0  ;;  %v1562_v11 = vcombine.low %v665_v1, %v669_v2  ;;  %v485_v13 = vrot.slane %v268_v54, %v2797_v15 }
  0xbb   : > { %2301 = vperm.xlu1 %2665, %v1264_v56   ;;  %v1312_v22 = vrot.slane %v1298_v3, %v2818_v23  ;;  %v1569_v24 = vrot.slane %v1559_v4, %v2818_v23  ;;  %v1576_v29 = vrot.slane %v1560_v5, %v2818_v23  ;;  %v489_v25 = vrot.slane %v268_v54, %v2800_v16 }
  0xbc   : > { %v1583_v27 = vrot.slane %v1561_v10, %v2818_v23  ;;  %v1590_v28 = vrot.slane %v1562_v11, %v2818_v23  ;;  %v493_v30 = vrot.slane %v268_v54, %v2803_v17  ;;  %v497_v31 = vrot.slane %v268_v54, %v2806_v18  ;;  %v310_v11 = vpop.xlane.xlu1 %309 }
  0xbd   : > { %v1313_v32 = vcombine.low %v1305_v7, %v1312_v22  ;;  %v1591_v33 = vcombine.low %v1569_v24, %v1576_v29  ;;  %v501_v34 = vrot.slane %v268_v54, %v2809_v19  ;;  %v505_v35 = vrot.slane %v268_v54, %v2812_v20 }
  0xbe   : > { %v1592_v36 = vcombine.low %v1583_v27, %v1590_v28  ;;  %v509_v38 = vrot.slane %v268_v54, %v2815_v21  ;;  %v1314_v39 = vcombine.low %v481_v6, %v485_v13  ;;  %v1315_v40 = vcombine.low %v489_v25, %v493_v30 }
  0xbf   : > { %2304 = vperm.xlu1 %2665, %v1313_v32   ;;  %v1599_v41 = vrot.slane %v1591_v33, %v2818_v23  ;;  %v1316_v42 = vcombine.low %v497_v31, %v501_v34  ;;  %v897_v43 = vrot.slane %v307_v26, %v2794_v14  ;;  %v901_v44 = vrot.slane %v307_v26, %v2797_v15 }
  0xc0   : > { %v1606_v45 = vrot.slane %v1592_v36, %v2818_v23  ;;  %v1317_v46 = vcombine.low %v505_v35, %v509_v38  ;;  %v1324_v47 = vrot.slane %v1314_v39, %v2818_v23  ;;  %v1331_v48 = vrot.slane %v1315_v40, %v2818_v23 }
  0xc1   : > { %v1338_v49 = vrot.slane %v1316_v42, %v2818_v23  ;;  %v905_v50 = vrot.slane %v307_v26, %v2800_v16  ;;  %v909_v51 = vrot.slane %v307_v26, %v2803_v17  ;;  %v913_v52 = vrot.slane %v307_v26, %v2806_v18  ;;  %v274_v42 = vpop.xlane.xlu0 %273 }
  0xc2   : > { %v1607_v53 = vcombine.low %v1599_v41, %v1606_v45  ;;  %v1345_v54 = vrot.slane %v1317_v46, %v2818_v23  ;;  %v1346_v56 = vcombine.low %v1324_v47, %v1331_v48  ;;  %v917_v57 = vrot.slane %v307_v26, %v2809_v19 }
  0xc3   : > { %v921_v58 = vrot.slane %v307_v26, %v2812_v20  ;;  %v925_v59 = vrot.slane %v307_v26, %v2815_v21  ;;  %v1951_v37 = vcombine.low %v897_v43, %v901_v44  ;;  %v1952_v60 = vcombine.low %v905_v50, %v909_v51 }
  0xc4   : > { %2322 = vperm.xlu0 %2664, %v1607_v53   ;;  %v1347_v61 = vcombine.low %v1338_v49, %v1345_v54  ;;  %v1354_v62 = vrot.slane %v1346_v56, %v2818_v23  ;;  %v1953_v63 = vcombine.low %v913_v52, %v917_v57  ;;  %v513_v0 = vrot.slane %v2846_v55, %v2794_v14 }
  0xc5   : > { %v1954_v1 = vcombine.low %v921_v58, %v925_v59  ;;  %v1961_v2 = vrot.slane %v1951_v37, %v2818_v23  ;;  %v1968_v3 = vrot.slane %v1952_v60, %v2818_v23  ;;  %v517_v4 = vrot.slane %v2846_v55, %v2797_v15 }
  0xc6   : > { %v1361_v5 = vrot.slane %v1347_v61, %v2818_v23  ;;  %v1975_v6 = vrot.slane %v1953_v63, %v2818_v23  ;;  %v521_v7 = vrot.slane %v2846_v55, %v2800_v16  ;;  %v525_v10 = vrot.slane %v2846_v55, %v2803_v17  ;;  %v313_v63 = vpop.xlane.xlu1 %312 }
  0xc7   : > { %v1982_v13 = vrot.slane %v1954_v1, %v2818_v23  ;;  %v1983_v22 = vcombine.low %v1961_v2, %v1968_v3  ;;  %v529_v24 = vrot.slane %v2846_v55, %v2806_v18  ;;  %v533_v29 = vrot.slane %v2846_v55, %v2809_v19 }
  0xc8   : > { %v1362_v25 = vcombine.low %v1354_v62, %v1361_v5  ;;  %v537_v26 = vrot.slane %v2846_v55, %v2812_v20  ;;  %v541_v27 = vrot.slane %v2846_v55, %v2815_v21  ;;  %v1363_v28 = vcombine.low %v513_v0, %v517_v4 }
  0xc9   : > { %v1984_v30 = vcombine.low %v1975_v6, %v1982_v13  ;;  %v1991_v31 = vrot.slane %v1983_v22, %v2818_v23  ;;  %v1364_v32 = vcombine.low %v521_v7, %v525_v10  ;;  %v1365_v33 = vcombine.low %v529_v24, %v533_v29 }
  0xca   : > { %2307 = vperm.xlu1 %2665, %v1362_v25   ;;  %v1366_v34 = vcombine.low %v537_v26, %v541_v27  ;;  %v1373_v35 = vrot.slane %v1363_v28, %v2818_v23  ;;  %v929_v36 = vrot.slane %v310_v11, %v2794_v14  ;;  %v933_v38 = vrot.slane %v310_v11, %v2797_v15 }
  0xcb   : > { %v1998_v39 = vrot.slane %v1984_v30, %v2818_v23  ;;  %v1380_v40 = vrot.slane %v1364_v32, %v2818_v23  ;;  %v1387_v55 = vrot.slane %v1365_v33, %v2818_v23  ;;  %v937_v41 = vrot.slane %v310_v11, %v2800_v16 }
  0xcc   : > { %v1394_v43 = vrot.slane %v1366_v34, %v2818_v23  ;;  %v941_v44 = vrot.slane %v310_v11, %v2803_v17  ;;  %v945_v45 = vrot.slane %v310_v11, %v2806_v18  ;;  %v949_v46 = vrot.slane %v310_v11, %v2809_v19 }
  0xcd   : > { %v1999_v47 = vcombine.low %v1991_v31, %v1998_v39  ;;  %v1395_v48 = vcombine.low %v1373_v35, %v1380_v40  ;;  %v953_v49 = vrot.slane %v310_v11, %v2812_v20  ;;  %v957_v50 = vrot.slane %v310_v11, %v2815_v21 }
  0xce   : > { %v1396_v51 = vcombine.low %v1387_v55, %v1394_v43  ;;  %v2000_v52 = vcombine.low %v929_v36, %v933_v38  ;;  %v2001_v53 = vcombine.low %v937_v41, %v941_v44  ;;  %v2002_v54 = vcombine.low %v945_v45, %v949_v46 }
  0xcf   : > { %2346 = vperm.xlu0 %2664, %v1999_v47   ;;  %v1403_v56 = vrot.slane %v1395_v48, %v2818_v23  ;;  %v2003_v57 = vcombine.low %v953_v49, %v957_v50  ;;  %v545_v58 = vrot.slane %v274_v42, %v2794_v14  ;;  %v549_v59 = vrot.slane %v274_v42, %v2797_v15 }
  0xd0   : > { %v1410_v37 = vrot.slane %v1396_v51, %v2818_v23  ;;  %v2010_v60 = vrot.slane %v2000_v52, %v2818_v23  ;;  %v2017_v61 = vrot.slane %v2001_v53, %v2818_v23  ;;  %v2024_v62 = vrot.slane %v2002_v54, %v2818_v23 }
  0xd1   : > { %v2031_v0 = vrot.slane %v2003_v57, %v2818_v23  ;;  %v553_v1 = vrot.slane %v274_v42, %v2800_v16  ;;  %v557_v2 = vrot.slane %v274_v42, %v2803_v17  ;;  %v561_v3 = vrot.slane %v274_v42, %v2806_v18  ;;  %v316_v57 = vpop.xlane.xlu1 %315 }
  0xd2   : > { %v1411_v4 = vcombine.low %v1403_v56, %v1410_v37  ;;  %v2032_v5 = vcombine.low %v2010_v60, %v2017_v61  ;;  %v565_v6 = vrot.slane %v274_v42, %v2809_v19  ;;  %v569_v7 = vrot.slane %v274_v42, %v2812_v20 }
  0xd3   : > { %v2033_v10 = vcombine.low %v2024_v62, %v2031_v0  ;;  %v573_v11 = vrot.slane %v274_v42, %v2815_v21  ;;  %v1412_v13 = vcombine.low %v545_v58, %v549_v59  ;;  %v1413_v22 = vcombine.low %v553_v1, %v557_v2 }
  0xd4   : > { %2310 = vperm.xlu1 %2665, %v1411_v4   ;;  %v2040_v24 = vrot.slane %v2032_v5, %v2818_v23  ;;  %v1414_v29 = vcombine.low %v561_v3, %v565_v6  ;;  %v961_v25 = vrot.slane %v313_v63, %v2794_v14  ;;  %v965_v26 = vrot.slane %v313_v63, %v2797_v15 }
  0xd5   : > { %v2047_v27 = vrot.slane %v2033_v10, %v2818_v23  ;;  %v1415_v28 = vcombine.low %v569_v7, %v573_v11  ;;  %v1422_v30 = vrot.slane %v1412_v13, %v2818_v23  ;;  %v1429_v31 = vrot.slane %v1413_v22, %v2818_v23 }
  0xd6   : > { %v1436_v32 = vrot.slane %v1414_v29, %v2818_v23  ;;  %v969_v33 = vrot.slane %v313_v63, %v2800_v16  ;;  %v973_v34 = vrot.slane %v313_v63, %v2803_v17  ;;  %v977_v35 = vrot.slane %v313_v63, %v2806_v18 }
  0xd7   : > { %v2048_v36 = vcombine.low %v2040_v24, %v2047_v27  ;;  %v1443_v38 = vrot.slane %v1415_v28, %v2818_v23  ;;  %v1444_v39 = vcombine.low %v1422_v30, %v1429_v31  ;;  %v981_v40 = vrot.slane %v313_v63, %v2809_v19  ;;  %v280_v24 = vpop.xlane.xlu0 %279 }
  0xd8   : > { %v985_v55 = vrot.slane %v313_v63, %v2812_v20  ;;  %v989_v41 = vrot.slane %v313_v63, %v2815_v21  ;;  %v2049_v42 = vcombine.low %v961_v25, %v965_v26  ;;  %v2050_v43 = vcombine.low %v969_v33, %v973_v34 }
  0xd9   : > { %2349 = vperm.xlu0 %2664, %v2048_v36   ;;  %v1445_v44 = vcombine.low %v1436_v32, %v1443_v38  ;;  %v1452_v45 = vrot.slane %v1444_v39, %v2818_v23  ;;  %v2051_v46 = vcombine.low %v977_v35, %v981_v40  ;;  %v577_v47 = vrot.slane %v2856_v8, %v2794_v14 }
  0xda   : > { %v2052_v48 = vcombine.low %v985_v55, %v989_v41  ;;  %v2059_v49 = vrot.slane %v2049_v42, %v2818_v23  ;;  %v2066_v50 = vrot.slane %v2050_v43, %v2818_v23  ;;  %v581_v51 = vrot.slane %v2856_v8, %v2797_v15 }
  0xdb   : > { %v1459_v52 = vrot.slane %v1445_v44, %v2818_v23  ;;  %v2073_v53 = vrot.slane %v2051_v46, %v2818_v23  ;;  %v585_v54 = vrot.slane %v2856_v8, %v2800_v16  ;;  %v589_v56 = vrot.slane %v2856_v8, %v2803_v17 }
  0xdc   : > { %v2080_v58 = vrot.slane %v2052_v48, %v2818_v23  ;;  %v2081_v59 = vcombine.low %v2059_v49, %v2066_v50  ;;  %v593_v37 = vrot.slane %v2856_v8, %v2806_v18  ;;  %v597_v60 = vrot.slane %v2856_v8, %v2809_v19 }
  0xdd   : > { %v1460_v61 = vcombine.low %v1452_v45, %v1459_v52  ;;  %v601_v62 = vrot.slane %v2856_v8, %v2812_v20  ;;  %v605_v63 = vrot.slane %v2856_v8, %v2815_v21  ;;  %v1461_v0 = vcombine.low %v577_v47, %v581_v51  ;;  %v319_v45 = vpop.xlane.xlu1 %318 }
  0xde   : > { %v2082_v1 = vcombine.low %v2073_v53, %v2080_v58  ;;  %v2089_v2 = vrot.slane %v2081_v59, %v2818_v23  ;;  %v1462_v3 = vcombine.low %v585_v54, %v589_v56  ;;  %v1463_v4 = vcombine.low %v593_v37, %v597_v60 }
  0xdf   : > { %2313 = vperm.xlu1 %2665, %v1460_v61   ;;  %v1464_v5 = vcombine.low %v601_v62, %v605_v63  ;;  %v1471_v6 = vrot.slane %v1461_v0, %v2818_v23  ;;  %v993_v7 = vrot.slane %v316_v57, %v2794_v14  ;;  %v997_v10 = vrot.slane %v316_v57, %v2797_v15 }
  0xe0   : > { %v2096_v11 = vrot.slane %v2082_v1, %v2818_v23  ;;  %v1478_v13 = vrot.slane %v1462_v3, %v2818_v23  ;;  %v1485_v8 = vrot.slane %v1463_v4, %v2818_v23  ;;  %v1001_v22 = vrot.slane %v316_v57, %v2800_v16 }
  0xe1   : > { %v1492_v29 = vrot.slane %v1464_v5, %v2818_v23  ;;  %v1005_v25 = vrot.slane %v316_v57, %v2803_v17  ;;  %v1009_v26 = vrot.slane %v316_v57, %v2806_v18  ;;  %v1013_v27 = vrot.slane %v316_v57, %v2809_v19 }
  0xe2   : > { %v2097_v28 = vcombine.low %v2089_v2, %v2096_v11  ;;  %v1493_v30 = vcombine.low %v1471_v6, %v1478_v13  ;;  %v1017_v31 = vrot.slane %v316_v57, %v2812_v20  ;;  %v1021_v32 = vrot.slane %v316_v57, %v2815_v21  ;;  %v304_v2 = vpop.xlane.xlu0 %303 }
  0xe3   : > { %v1494_v33 = vcombine.low %v1485_v8, %v1492_v29  ;;  %v2098_v34 = vcombine.low %v993_v7, %v997_v10  ;;  %v2099_v35 = vcombine.low %v1001_v22, %v1005_v25  ;;  %v2100_v36 = vcombine.low %v1009_v26, %v1013_v27 }
  0xe4   : > { %2352 = vperm.xlu0 %2664, %v2097_v28   ;;  %v1501_v38 = vrot.slane %v1493_v30, %v2818_v23  ;;  %v2101_v39 = vcombine.low %v1017_v31, %v1021_v32  ;;  %v609_v40 = vrot.slane %v280_v24, %v2794_v14  ;;  %v613_v55 = vrot.slane %v280_v24, %v2797_v15 }
  0xe5   : > { %v1508_v41 = vrot.slane %v1494_v33, %v2818_v23  ;;  %v2108_v42 = vrot.slane %v2098_v34, %v2818_v23  ;;  %v2115_v43 = vrot.slane %v2099_v35, %v2818_v23  ;;  %v2122_v44 = vrot.slane %v2100_v36, %v2818_v23 }
  0xe6   : > { %v2129_v46 = vrot.slane %v2101_v39, %v2818_v23  ;;  %v617_v47 = vrot.slane %v280_v24, %v2800_v16  ;;  %v621_v48 = vrot.slane %v280_v24, %v2803_v17  ;;  %v625_v49 = vrot.slane %v280_v24, %v2806_v18  ;;  %v322_v39 = vpop.xlane.xlu1 %321 }
  0xe7   : > { %v1509_v50 = vcombine.low %v1501_v38, %v1508_v41  ;;  %v2130_v51 = vcombine.low %v2108_v42, %v2115_v43  ;;  %v629_v52 = vrot.slane %v280_v24, %v2809_v19  ;;  %v633_v53 = vrot.slane %v280_v24, %v2812_v20 }
  0xe8   : > { %v2131_v54 = vcombine.low %v2122_v44, %v2129_v46  ;;  %v637_v56 = vrot.slane %v280_v24, %v2815_v21  ;;  %v1510_v57 = vcombine.low %v609_v40, %v613_v55  ;;  %v1511_v58 = vcombine.low %v617_v47, %v621_v48 }
  0xe9   : > { %2316 = vperm.xlu1 %2665, %v1509_v50   ;;  %v2138_v59 = vrot.slane %v2130_v51, %v2818_v23  ;;  %v1512_v37 = vcombine.low %v625_v49, %v629_v52  ;;  %v1025_v60 = vrot.slane %v319_v45, %v2794_v14  ;;  %v1029_v61 = vrot.slane %v319_v45, %v2797_v15 }
  0xea   : > { %v2145_v62 = vrot.slane %v2131_v54, %v2818_v23  ;;  %v1513_v63 = vcombine.low %v633_v53, %v637_v56  ;;  %v1520_v0 = vrot.slane %v1510_v57, %v2818_v23  ;;  %v1527_v1 = vrot.slane %v1511_v58, %v2818_v23 }
  0xeb   : > { %v1534_v3 = vrot.slane %v1512_v37, %v2818_v23  ;;  %v1033_v4 = vrot.slane %v319_v45, %v2800_v16  ;;  %v1037_v5 = vrot.slane %v319_v45, %v2803_v17  ;;  %v1041_v6 = vrot.slane %v319_v45, %v2806_v18  ;;  %v286_v37 = vpop.xlane.xlu0 %285 }
  0xec   : > { %v2146_v7 = vcombine.low %v2138_v59, %v2145_v62  ;;  %v1541_v10 = vrot.slane %v1513_v63, %v2818_v23  ;;  %v1542_v11 = vcombine.low %v1520_v0, %v1527_v1  ;;  %v1045_v13 = vrot.slane %v319_v45, %v2809_v19 }
  0xed   : > { %v1049_v8 = vrot.slane %v319_v45, %v2812_v20  ;;  %v1053_v22 = vrot.slane %v319_v45, %v2815_v21  ;;  %v2147_v24 = vcombine.low %v1025_v60, %v1029_v61  ;;  %v2148_v29 = vcombine.low %v1033_v4, %v1037_v5 }
  0xee   : > { %2355 = vperm.xlu0 %2664, %v2146_v7   ;;  %v1543_v25 = vcombine.low %v1534_v3, %v1541_v10  ;;  %v1550_v26 = vrot.slane %v1542_v11, %v2818_v23  ;;  %v2149_v27 = vcombine.low %v1041_v6, %v1045_v13  ;;  %v865_v28 = vrot.slane %v304_v2, %v2794_v14 }
  0xef   : > { %v2150_v30 = vcombine.low %v1049_v8, %v1053_v22  ;;  %v2157_v31 = vrot.slane %v2147_v24, %v2818_v23  ;;  %v2164_v32 = vrot.slane %v2148_v29, %v2818_v23  ;;  %v869_v33 = vrot.slane %v304_v2, %v2797_v15 }
  0xf0   : > { %v1557_v34 = vrot.slane %v1543_v25, %v2818_v23  ;;  %v2171_v35 = vrot.slane %v2149_v27, %v2818_v23  ;;  %v873_v36 = vrot.slane %v304_v2, %v2800_v16  ;;  %v877_v38 = vrot.slane %v304_v2, %v2803_v17 }
  0xf1   : > { %v2178_v40 = vrot.slane %v2150_v30, %v2818_v23  ;;  %v2179_v55 = vcombine.low %v2157_v31, %v2164_v32  ;;  %v881_v41 = vrot.slane %v304_v2, %v2806_v18  ;;  %v885_v42 = vrot.slane %v304_v2, %v2809_v19 }
  0xf2   : > { %v1558_v43 = vcombine.low %v1550_v26, %v1557_v34  ;;  %v889_v44 = vrot.slane %v304_v2, %v2812_v20  ;;  %v893_v45 = vrot.slane %v304_v2, %v2815_v21  ;;  %v1902_v46 = vcombine.low %v865_v28, %v869_v33  ;;  %v325_v26 = vpop.xlane.xlu1 %324 }
  0xf3   : > { %v2180_v47 = vcombine.low %v2171_v35, %v2178_v40  ;;  %v2187_v48 = vrot.slane %v2179_v55, %v2818_v23  ;;  %v1903_v49 = vcombine.low %v873_v36, %v877_v38  ;;  %v1904_v50 = vcombine.low %v881_v41, %v885_v42  ;;  %v289_v36 = vpop.xlane.xlu0 %288 }
  0xf4   : > { %2319 = vperm.xlu1 %2665, %v1558_v43   ;;  %v1905_v51 = vcombine.low %v889_v44, %v893_v45  ;;  %v1912_v52 = vrot.slane %v1902_v46, %v2818_v23  ;;  %v1057_v53 = vrot.slane %v322_v39, %v2794_v14  ;;  %v1061_v54 = vrot.slane %v322_v39, %v2797_v15 }
  0xf5   : > { %v2194_v56 = vrot.slane %v2180_v47, %v2818_v23  ;;  %v1919_v57 = vrot.slane %v1903_v49, %v2818_v23  ;;  %v1926_v58 = vrot.slane %v1904_v50, %v2818_v23  ;;  %v1065_v59 = vrot.slane %v322_v39, %v2800_v16 }
  0xf6   : > { %v1933_v60 = vrot.slane %v1905_v51, %v2818_v23  ;;  %v1069_v61 = vrot.slane %v322_v39, %v2803_v17  ;;  %v1073_v62 = vrot.slane %v322_v39, %v2806_v18  ;;  %v1077_v63 = vrot.slane %v322_v39, %v2809_v19 }
  0xf7   : > { %v2195_v0 = vcombine.low %v2187_v48, %v2194_v56  ;;  %v1934_v1 = vcombine.low %v1912_v52, %v1919_v57  ;;  %v1081_v2 = vrot.slane %v322_v39, %v2812_v20  ;;  %v1085_v3 = vrot.slane %v322_v39, %v2815_v21 }
  0xf8   : > { %v1935_v4 = vcombine.low %v1926_v58, %v1933_v60  ;;  %v2196_v5 = vcombine.low %v1057_v53, %v1061_v54  ;;  %v2197_v6 = vcombine.low %v1065_v59, %v1069_v61  ;;  %v2198_v7 = vcombine.low %v1073_v62, %v1077_v63  ;;  %v292_v61 = vpop.xlane.xlu0 %291 }
  0xf9   : > { %2358 = vperm.xlu0 %2664, %v2195_v0   ;;  %v1942_v10 = vrot.slane %v1934_v1, %v2818_v23  ;;  %v2199_v11 = vcombine.low %v1081_v2, %v1085_v3  ;;  %v673_v13 = vrot.slane %v286_v37, %v2794_v14  ;;  %v677_v8 = vrot.slane %v286_v37, %v2797_v15 }
  0xfa   : > { %v1949_v22 = vrot.slane %v1935_v4, %v2818_v23  ;;  %v2206_v24 = vrot.slane %v2196_v5, %v2818_v23  ;;  %v2213_v29 = vrot.slane %v2197_v6, %v2818_v23  ;;  %v2220_v25 = vrot.slane %v2198_v7, %v2818_v23 }
  0xfb   : > { %v2227_v27 = vrot.slane %v2199_v11, %v2818_v23  ;;  %v681_v28 = vrot.slane %v286_v37, %v2800_v16  ;;  %v685_v30 = vrot.slane %v286_v37, %v2803_v17  ;;  %v689_v31 = vrot.slane %v286_v37, %v2806_v18 }
  0xfc   : > { %v1950_v32 = vcombine.low %v1942_v10, %v1949_v22  ;;  %v2228_v33 = vcombine.low %v2206_v24, %v2213_v29  ;;  %v693_v34 = vrot.slane %v286_v37, %v2809_v19  ;;  %v697_v35 = vrot.slane %v286_v37, %v2812_v20 }
  0xfd   : > { %v2229_v38 = vcombine.low %v2220_v25, %v2227_v27  ;;  %v701_v39 = vrot.slane %v286_v37, %v2815_v21  ;;  %v1608_v40 = vcombine.low %v673_v13, %v677_v8  ;;  %v1609_v55 = vcombine.low %v681_v28, %v685_v30 }
  0xfe   : > { %2343 = vperm.xlu1 %2665, %v1950_v32   ;;  %v2236_v41 = vrot.slane %v2228_v33, %v2818_v23  ;;  %v1610_v42 = vcombine.low %v689_v31, %v693_v34  ;;  %v1089_v43 = vrot.slane %v325_v26, %v2794_v14  ;;  %v1093_v44 = vrot.slane %v325_v26, %v2797_v15  ;;  %v295_v33 = vpop.xlane.xlu0 %294 }
  0xff   : > { %v2243_v45 = vrot.slane %v2229_v38, %v2818_v23  ;;  %v1611_v46 = vcombine.low %v697_v35, %v701_v39  ;;  %v1618_v47 = vrot.slane %v1608_v40, %v2818_v23  ;;  %v1625_v48 = vrot.slane %v1609_v55, %v2818_v23 }
 0x100   : > { %v1632_v49 = vrot.slane %v1610_v42, %v2818_v23  ;;  %v1097_v50 = vrot.slane %v325_v26, %v2800_v16  ;;  %v1101_v51 = vrot.slane %v325_v26, %v2803_v17  ;;  %v1105_v52 = vrot.slane %v325_v26, %v2806_v18 }
 0x101   : > { %v2244_v53 = vcombine.low %v2236_v41, %v2243_v45  ;;  %v1639_v54 = vrot.slane %v1611_v46, %v2818_v23  ;;  %v1640_v56 = vcombine.low %v1618_v47, %v1625_v48  ;;  %v1109_v57 = vrot.slane %v325_v26, %v2809_v19 }
 0x102   : > { %v1113_v58 = vrot.slane %v325_v26, %v2812_v20  ;;  %v1117_v59 = vrot.slane %v325_v26, %v2815_v21  ;;  %v2245_v37 = vcombine.low %v1089_v43, %v1093_v44  ;;  %v2246_v60 = vcombine.low %v1097_v50, %v1101_v51 }
 0x103   : > { %2361 = vperm.xlu0 %2664, %v2244_v53   ;;  %v1641_v62 = vcombine.low %v1632_v49, %v1639_v54  ;;  %v1648_v63 = vrot.slane %v1640_v56, %v2818_v23  ;;  %v2247_v0 = vcombine.low %v1105_v52, %v1109_v57  ;;  %v705_v1 = vrot.slane %v289_v36, %v2794_v14 }
 0x104   : > { %v2248_v2 = vcombine.low %v1113_v58, %v1117_v59  ;;  %v2255_v3 = vrot.slane %v2245_v37, %v2818_v23  ;;  %v2262_v4 = vrot.slane %v2246_v60, %v2818_v23  ;;  %v709_v5 = vrot.slane %v289_v36, %v2797_v15  ;;  %v298_v59 = vpop.xlane.xlu0 %297 }
 0x105   : > { %v1655_v6 = vrot.slane %v1641_v62, %v2818_v23  ;;  %v2269_v7 = vrot.slane %v2247_v0, %v2818_v23  ;;  %v713_v10 = vrot.slane %v289_v36, %v2800_v16  ;;  %v717_v11 = vrot.slane %v289_v36, %v2803_v17 }
 0x106   : > { %v2276_v13 = vrot.slane %v2248_v2, %v2818_v23  ;;  %v2277_v8 = vcombine.low %v2255_v3, %v2262_v4  ;;  %v721_v22 = vrot.slane %v289_v36, %v2806_v18  ;;  %v725_v24 = vrot.slane %v289_v36, %v2809_v19 }
 0x107   : > { %v1656_v29 = vcombine.low %v1648_v63, %v1655_v6  ;;  %v729_v25 = vrot.slane %v289_v36, %v2812_v20  ;;  %v733_v26 = vrot.slane %v289_v36, %v2815_v21  ;;  %v1657_v27 = vcombine.low %v705_v1, %v709_v5 }
 0x108   : > { %v2278_v28 = vcombine.low %v2269_v7, %v2276_v13  ;;  %v2285_v30 = vrot.slane %v2277_v8, %v2818_v23  ;;  %v1658_v31 = vcombine.low %v713_v10, %v717_v11  ;;  %v1659_v32 = vcombine.low %v721_v22, %v725_v24 }
 0x109   : > { %2325 = vperm.xlu1 %2665, %v1656_v29   ;;  %v1660_v34 = vcombine.low %v729_v25, %v733_v26  ;;  %v1667_v35 = vrot.slane %v1657_v27, %v2818_v23  ;;  %v737_v38 = vrot.slane %v292_v61, %v2794_v14  ;;  %v741_v39 = vrot.slane %v292_v61, %v2797_v15 }
 0x10a   : > { %v2292_v40 = vrot.slane %v2278_v28, %v2818_v23  ;;  %v1674_v55 = vrot.slane %v1658_v31, %v2818_v23  ;;  %v1681_v36 = vrot.slane %v1659_v32, %v2818_v23  ;;  %v745_v41 = vrot.slane %v292_v61, %v2800_v16 }
 0x10b   : > { %v1688_v42 = vrot.slane %v1660_v34, %v2818_v23  ;;  %v749_v43 = vrot.slane %v292_v61, %v2803_v17  ;;  %v753_v44 = vrot.slane %v292_v61, %v2806_v18  ;;  %v757_v45 = vrot.slane %v292_v61, %v2809_v19 }
 0x10c   : > { %v2293_v46 = vcombine.low %v2285_v30, %v2292_v40  ;;  %v1689_v47 = vcombine.low %v1667_v35, %v1674_v55  ;;  %v761_v48 = vrot.slane %v292_v61, %v2812_v20  ;;  %v765_v49 = vrot.slane %v292_v61, %v2815_v21  ;;  %v301_v30 = vpop.xlane.xlu0 %300 }
 0x10d   : > { %v1690_v50 = vcombine.low %v1681_v36, %v1688_v42  ;;  %v1706_v51 = vcombine.low %v737_v38, %v741_v39  ;;  %v1707_v52 = vcombine.low %v745_v41, %v749_v43  ;;  %v1708_v53 = vcombine.low %v753_v44, %v757_v45 }
 0x10e   : > { %2364 = vperm.xlu0 %2664, %v2293_v46   ;;  %v1697_v54 = vrot.slane %v1689_v47, %v2818_v23  ;;  %v1709_v56 = vcombine.low %v761_v48, %v765_v49  ;;  %v769_v57 = vrot.slane %v295_v33, %v2794_v14  ;;  %v773_v58 = vrot.slane %v295_v33, %v2797_v15 }
 0x10f   : > { %v1704_v37 = vrot.slane %v1690_v50, %v2818_v23  ;;  %v1716_v60 = vrot.slane %v1706_v51, %v2818_v23  ;;  %v1723_v62 = vrot.slane %v1707_v52, %v2818_v23  ;;  %v1730_v61 = vrot.slane %v1708_v53, %v2818_v23 }
 0x110   : > { %v1737_v63 = vrot.slane %v1709_v56, %v2818_v23  ;;  %v777_v0 = vrot.slane %v295_v33, %v2800_v16  ;;  %v781_v1 = vrot.slane %v295_v33, %v2803_v17  ;;  %v785_v2 = vrot.slane %v295_v33, %v2806_v18 }
 0x111   : > { %v1705_v3 = vcombine.low %v1697_v54, %v1704_v37  ;;  %v1738_v4 = vcombine.low %v1716_v60, %v1723_v62  ;;  %v789_v5 = vrot.slane %v295_v33, %v2809_v19  ;;  %v793_v6 = vrot.slane %v295_v33, %v2812_v20 }
 0x112   : > { %v1739_v7 = vcombine.low %v1730_v61, %v1737_v63  ;;  %v797_v10 = vrot.slane %v295_v33, %v2815_v21  ;;  %v1755_v11 = vcombine.low %v769_v57, %v773_v58  ;;  %v1756_v13 = vcombine.low %v777_v0, %v781_v1 }
 0x113   : > { %2328 = vperm.xlu1 %2665, %v1705_v3   ;;  %v1746_v8 = vrot.slane %v1738_v4, %v2818_v23  ;;  %v1757_v22 = vcombine.low %v785_v2, %v789_v5  ;;  %v801_v24 = vrot.slane %v298_v59, %v2794_v14  ;;  %v805_v29 = vrot.slane %v298_v59, %v2797_v15 }
 0x114   : > { %v1753_v25 = vrot.slane %v1739_v7, %v2818_v23  ;;  %v1758_v26 = vcombine.low %v793_v6, %v797_v10  ;;  %v1765_v27 = vrot.slane %v1755_v11, %v2818_v23  ;;  %v1772_v28 = vrot.slane %v1756_v13, %v2818_v23 }
 0x115   : > { %v1779_v31 = vrot.slane %v1757_v22, %v2818_v23  ;;  %v809_v32 = vrot.slane %v298_v59, %v2800_v16  ;;  %v813_v33 = vrot.slane %v298_v59, %v2803_v17  ;;  %v817_v34 = vrot.slane %v298_v59, %v2806_v18 }
 0x116   : > { %v1754_v35 = vcombine.low %v1746_v8, %v1753_v25  ;;  %v1786_v38 = vrot.slane %v1758_v26, %v2818_v23  ;;  %v1787_v39 = vcombine.low %v1765_v27, %v1772_v28  ;;  %v821_v40 = vrot.slane %v298_v59, %v2809_v19 }
 0x117   : > { %v825_v55 = vrot.slane %v298_v59, %v2812_v20  ;;  %v829_v36 = vrot.slane %v298_v59, %v2815_v21  ;;  %v1804_v41 = vcombine.low %v801_v24, %v805_v29  ;;  %v1805_v42 = vcombine.low %v809_v32, %v813_v33 }
 0x118   : > { %2331 = vperm.xlu1 %2665, %v1754_v35   ;;  %v1788_v43 = vcombine.low %v1779_v31, %v1786_v38  ;;  %v1795_v44 = vrot.slane %v1787_v39, %v2818_v23  ;;  %v1806_v45 = vcombine.low %v817_v34, %v821_v40  ;;  %v833_v46 = vrot.slane %v301_v30, %v2794_v14 }
 0x119   : > { %v1807_v47 = vcombine.low %v825_v55, %v829_v36  ;;  %v1814_v48 = vrot.slane %v1804_v41, %v2818_v23  ;;  %v1821_v49 = vrot.slane %v1805_v42, %v2818_v23  ;;  %v837_v50 = vrot.slane %v301_v30, %v2797_v15 }
 0x11a   : > { %v1802_v51 = vrot.slane %v1788_v43, %v2818_v23  ;;  %v1828_v52 = vrot.slane %v1806_v45, %v2818_v23  ;;  %v841_v53 = vrot.slane %v301_v30, %v2800_v16  ;;  %v845_v54 = vrot.slane %v301_v30, %v2803_v17 }
 0x11b   : > { %v1835_v56 = vrot.slane %v1807_v47, %v2818_v23  ;;  %v1836_v57 = vcombine.low %v1814_v48, %v1821_v49  ;;  %v849_v58 = vrot.slane %v301_v30, %v2806_v18  ;;  %v853_v59 = vrot.slane %v301_v30, %v2809_v19 }
 0x11c   : > { %v1803_v37 = vcombine.low %v1795_v44, %v1802_v51  ;;  %v857_v60 = vrot.slane %v301_v30, %v2812_v20  ;;  %v861_v62 = vrot.slane %v301_v30, %v2815_v21  ;;  %v1853_v61 = vcombine.low %v833_v46, %v837_v50 }
 0x11d   : > { %v1837_v63 = vcombine.low %v1828_v52, %v1835_v56  ;;  %v1844_v0 = vrot.slane %v1836_v57, %v2818_v23  ;;  %v1854_v1 = vcombine.low %v841_v53, %v845_v54  ;;  %v1855_v16 = vcombine.low %v849_v58, %v853_v59 }
 0x11e   : > { %2334 = vperm.xlu1 %2665, %v1803_v37   ;;  %v1856_v17 = vcombine.low %v857_v60, %v861_v62  ;;  %v1863_v2 = vrot.slane %v1853_v61, %v2818_v23  ;;  %v2692_v13 = vmov 0.0   ;;  %v3206_v38 = vand.u32 127, %v200_v9 }
 0x11f   : > { %v1851_v3 = vrot.slane %v1837_v63, %v2818_v23  ;;  %v1870_v18 = vrot.slane %v1854_v1, %v2818_v23  ;;  %v1877_v19 = vrot.slane %v1855_v16, %v2818_v23  ;;  %204 = vst.msk [vmem:[#allocation2] sm:$0x3] %vm3187_vm0, %v2692_v13 }
 0x120   : > { %v1884_v20 = vrot.slane %v1856_v17, %v2818_v23  ;;  %v2372_v40 = vadd.s32 4294967288, %v3206_v38  ;;  %v2379_v55 = vadd.s32 4294967280, %v3206_v38  ;;  %v2386_v36 = vadd.s32 4294967272, %v3206_v38 }
 0x121   : > { %v1852_v4 = vcombine.low %v1844_v0, %v1851_v3  ;;  %v1885_v21 = vcombine.low %v1863_v2, %v1870_v18  ;;  %v2393_v41 = vadd.s32 4294967264, %v3206_v38  ;;  %v2400_v44 = vadd.s32 4294967256, %v3206_v38 }
 0x122   : > { %v1886_v5 = vcombine.low %v1877_v19, %v1884_v20  ;;  %v2375_v43 = vsub.s32 %v2372_v40, %v2791_v12  ;;  %v2382_v9 = vsub.s32 %v2379_v55, %v2791_v12  ;;  %v3222_v46 = vadd.s32 4294967224, %v3206_v38 }
 0x123   : > { %2337 = vperm.xlu1 %2665, %v1852_v4   ;;  %v1893_v6 = vrot.slane %v1885_v21, %v2818_v23  ;;  %v2407_v47 = vadd.s32 4294967248, %v3206_v38  ;;  %v2414_v48 = vadd.s32 4294967240, %v3206_v38  ;;  %v2370_v49 = vsub.s32 %v3206_v38, %v2791_v12 }
 0x124   : > { %v1900_v7 = vrot.slane %v1886_v5, %v2818_v23  ;;  %v2389_v50 = vsub.s32 %v2386_v36, %v2791_v12  ;;  %v2396_v51 = vsub.s32 %v2393_v41, %v2791_v12  ;;  %v2421_v52 = vadd.s32 4294967232, %v3206_v38 }
 0x125   : > { %v3232_v54 = vsub.s32 %v2400_v44, %v2791_v12  ;;  %v2431_v58 = vsub.s32 %v3222_v46, %v2791_v12  ;;  %v3237_v59 = vsub.s32 %v2407_v47, %v2791_v12  ;;  %v3240_v37 = vsub.s32 %v2414_v48, %v2791_v12 }
 0x126   : > { %v1901_v10 = vcombine.low %v1893_v6, %v1900_v7  ;;  %v2435_v1 = vadd.s32 4294967216, %v3206_v38  ;;  %v2424_v17 = vsub.s32 %v2421_v52, %v2791_v12  ;;  %v2442_v19 = vadd.s32 4294967208, %v3206_v38 }
 0x127   : > { %v2449_v5 = vadd.s32 4294967200, %v3206_v38  ;;  %v2456_v13 = vadd.s32 4294967192, %v3206_v38  ;;  %v2470_v36 = vadd.s32 4294967176, %v3206_v38 }
 0x128   : > { %2340 = vperm.xlu1 %2665, %v1901_v10   ;;  %v2438_v10 = vsub.s32 %v2435_v1, %v2791_v12 }
 0x129   : > { %v2459_v55 = vsub.s32 %v2456_v13, %v2791_v12 }
 0x130   : > { %v2296_v27 = vpop.permute.xlu0 %2295 }
 0x131   : > { %v2371_v61 = vrot.slane %v2296_v27, %v2370_v49 }
 0x136   : > { %v2299_v8 = vpop.permute.xlu1 %2298 }
 0x137   : > { %v2376_v53 = vrot.slane %v2299_v8, %v2375_v43 }
 0x139   : > { %v2378_v2 = vsel %vm2377_vm1, %v2376_v53, %v2371_v61 }
 0x13a   : > { %v2302_v22 = vpop.permute.xlu1 %2301 }
 0x13b   : > { %v2383_v57 = vrot.slane %v2302_v22, %v2382_v9 }
 0x13d   : > { %v2385_v20 = vsel %vm2384_vm2, %v2383_v57, %v2378_v2  ;;  %v2542_v2 = vld [vmem:[%s3308_s1] sm:$0x3] }
 0x13e   : > { %v2305_v24 = vpop.permute.xlu1 %2304 }
 0x13f   : > { %v2390_v63 = vrot.slane %v2305_v24, %v2389_v50 }
 0x141   : > { %v2392_v6 = vsel %vm2391_vm3, %v2390_v63, %v2385_v20 }
 0x143   : > { %v3199_v28 = vpop.permute.xlu0 %2322 }
 0x149   : > { %v3193_v29 = vpop.permute.xlu1 %2307 }
 0x14a   : > { %v2397_v16 = vrot.slane %v3193_v29, %v2396_v51 }
 0x14c   : > { %v2399_v8 = vsel %vm2398_vm4, %v2397_v16, %v2392_v6  ;;  %v253_v16 = vld [vmem:[#allocation2] sm:$0x3] }
 0x14e   : > { %v2347_v31 = vpop.permute.xlu0 %2346 }
 0x14f   : > { %v2484_v0 = vrot.slane %v2347_v31, %v2375_v43 }
 0x153   : > { %v3195_v25 = vpop.permute.xlu1 %2310 }
 0x154   : > { %v2404_v3 = vrot.slane %v3195_v25, %v3232_v54 }
 0x156   : > { %v2406_v27 = vsel %vm2405_vm5, %v2404_v3, %v2399_v8 }
 0x158   : > { %v2350_v33 = vpop.permute.xlu0 %2349 }
 0x159   : > { %v2489_v21 = vrot.slane %v2350_v33, %v2382_v9  ;;  %v2432_v9 = vrot.slane %v3199_v28, %v2431_v58 }
 0x15e   : > { %v3197_v26 = vpop.permute.xlu1 %2313 }
 0x15f   : > { %v2411_v4 = vrot.slane %v3197_v26, %v3237_v59  ;;  %v2463_v26 = vadd.s32 4294967184, %v3206_v38 }
 0x161   : > { %v2413_v33 = vsel %vm2412_vm6, %v2411_v4, %v2406_v27  ;;  %v2466_v44 = vsub.s32 %v2463_v26, %v2791_v12 }
 0x163   : > { %v3203_v35 = vpop.permute.xlu0 %2352 }
 0x164   : > { %v2494_v31 = vrot.slane %v3203_v35, %v2389_v50 }
 0x168   : > { %v3201_v30 = vpop.permute.xlu1 %2316 }
 0x169   : > { %v2418_v7 = vrot.slane %v3201_v30, %v3240_v37  ;;  %v2445_v30 = vsub.s32 %v2442_v19, %v2791_v12 }
 0x16d   : > { %v3214_v42 = vpop.permute.xlu0 %2355 }
 0x16e   : > { %v2499_v43 = vrot.slane %v3214_v42, %v2396_v51 }
 0x173   : > { %v2320_v32 = vpop.permute.xlu1 %2319 }
 0x174   : > { %v2425_v22 = vrot.slane %v2320_v32, %v2424_v17  ;;  %v2420_v32 = vsel %vm2419_vm7, %v2418_v7, %v2413_v33 }
 0x176   : > { %v2427_v41 = vsel %vm2426_vm8, %v2425_v22, %v2420_v32 }
 0x177   : > { %v2434_v42 = vsel %vm2433_vm9, %v2432_v9, %v2427_v41 }
 0x178   : > { %v2359_v60 = vpop.permute.xlu0 %2358 }
 0x179   : > { %v2504_v38 = vrot.slane %v2359_v60, %v3232_v54 }
 0x17d   : > { %v2344_v34 = vpop.permute.xlu1 %2343 }
 0x17e   : > { %v2480_v56 = vrot.slane %v2344_v34, %v2370_v49  ;;  %v2452_v34 = vsub.s32 %v2449_v5, %v2791_v12  ;;  %v2563_v5 = vstv %s2562_s23 }
 0x180   : > { %v2485_v18 = vsel %vm2377_vm1, %v2484_v0, %v2480_v56  ;;  %vm2555_vm1 = vcmask 1040384  }
 0x181   : > { %v2490_v24 = vsel %vm2384_vm2, %v2489_v21, %v2485_v18  ;;  %vm2557_vm2 = vcmask 516096  }
 0x182   : > { %v2362_v29 = vpop.permute.xlu0 %2361  ;;  %v2495_v40 = vsel %vm2391_vm3, %v2494_v31, %v2490_v24 }
 0x183   : > { %v2500_v48 = vsel %vm2398_vm4, %v2499_v43, %v2495_v40  ;;  %v2509_v28 = vrot.slane %v2362_v29, %v3237_v59 }
 0x188   : > { %v3208_v39 = vpop.permute.xlu1 %2325 }
 0x189   : > { %v2439_v35 = vrot.slane %v3208_v39, %v2438_v10  ;;  %v2473_v39 = vsub.s32 %v2470_v36, %v2791_v12 }
 0x18b   : > { %v2441_v52 = vsel %vm2440_vm10, %v2439_v35, %v2434_v42 }
 0x18d   : > { %v2365_v49 = vpop.permute.xlu0 %2364 }
 0x18e   : > { %v2514_v57 = vrot.slane %v2365_v49, %v3240_v37 }
 0x192   : > { %v3218_v45 = vpop.permute.xlu1 %2328 }
 0x193   : > { %v2446_v46 = vrot.slane %v3218_v45, %v2445_v30  ;;  %v2505_v45 = vsel %vm2405_vm5, %v2504_v38, %v2500_v48 }
 0x194   : > { %v2510_v61 = vsel %vm2412_vm6, %v2509_v28, %v2505_v45 }
 0x195   : > { %v2448_v56 = vsel %vm2447_vm11, %v2446_v46, %v2441_v52  ;;  %v2515_v12 = vsel %vm2419_vm7, %v2514_v57, %v2510_v61 }
 0x197   : > { %v2332_v62 = vpop.permute.xlu1 %2331 }
 0x198   : > { %v2453_v50 = vrot.slane %v2332_v62, %v2452_v34 }
 0x19a   : > { %v2455_v58 = vsel %vm2454_vm12, %v2453_v50, %v2448_v56 }
 0x19d   : > { %v2335_v25 = vpop.permute.xlu1 %2334 }
 0x19e   : > { %v2460_v51 = vrot.slane %v2335_v25, %v2459_v55 }
 0x1a0   : > { %v2462_v54 = vsel %vm2461_vm13, %v2460_v51, %v2455_v58 }
 0x1a2   : > { %v2338_v47 = vpop.permute.xlu1 %2337 }
 0x1a3   : > { %v2467_v53 = vrot.slane %v2338_v47, %v2466_v44 }
 0x1a5   : > { %v2469_v63 = vsel %vm2468_vm14, %v2467_v53, %v2462_v54 }
 0x1a7   : > { %v2341_v62 = vpop.permute.xlu1 %2340 }
 0x1a8   : > { %v2474_v60 = vrot.slane %v2341_v62, %v2473_v39 }
 0x1aa   : > { %v2476_v0 = vsel %vm2475_vm15, %v2474_v60, %v2469_v63 }
 0x1ab   : > { %v2516_v59 = vcombine.low %v2476_v0, %v2515_v12 }
 0x1ad   : > { %v2523_v1 = vrot.slane %v2516_v59, %v2818_v23 }
 0x1af   : > { %v2530_v17 = vrot.slane %v2523_v1, %v2818_v23 }
 0x1b1   : > { %v2532_v37 = vadd.f32 %v2530_v17, %v253_v16 }
 0x1b3   : > { %2537 = vst.msk [vmem:[#allocation2] sm:$0x3] %vm3187_vm0, %v2532_v37  ;;  %vm2565_vm0 = vcmask 0  }
 0x1ba   : > { %v2541_v3 = vld [vmem:[#allocation2] sm:$0x3] }
 0x1bb   : > { %v2543_v18 = vmul.f32 %v2542_v2, %v2541_v3 }
 0x1bd   : > { %v2548_v19 = vrot.slane %v2543_v18, %v2794_v14  ;;  %v2552_v20 = vrot.slane %v2543_v18, %v2797_v15 }
 0x1bf   : > { %v2556_v4 = vsel %vm2555_vm1, %v2548_v19, 0.0  ;;  %v2558_v21 = vsel %vm2557_vm2, %v2552_v20, 0.0 }
 0x1c0   : > { %v2559_v23 = vadd.f32 %v2558_v21, %v2556_v4 }
 0x1c2   : > { %2560 = vadd.xlane.f32.xlu1 %v2559_v23 }
 0x24f   : > { %v2561_v11 = vpop.xlane.xlu1 %2560 }
 0x250   : > { %v2564_v6 = vadd.f32 %v2563_v5, %v2561_v11 }
 0x252   : > { %2566 = vst.msk [vmem:[%s195_s26] sm:$0x1] %vm2565_vm0, %v2564_v6 }
 0x253 PF: > { %s14_s16 = sadd.s32 1, %s2688_s16   ;;  %s3313_s14 = smov %s2684_s15 }
 0x254   : > { %p11_p5 = scmp.ge.s32.totalorder %s14_s16, 4   ;;  %s3314_s15 = smov %s3316_s2 }
 0x256   :  { %13 = sbr.rel (!%p11_p5) target bundleno = 2 (0x2), region = 70 }

</bundles_post_ra>
